<compile_context>
chip_gen: v6e
topology: v6e:2x2x1
jax: 0.10.0
libtpu: 0.0.40
codegen_flags: <defaults>
</compile_context>

<pallas_src>
import math
import functools

import jax
import jax.numpy as jnp
from jax.experimental import pallas as pl
from jax.experimental.pallas import tpu as pltpu


_NEG_BIG = -1e30                     # finite mask sentinel (avoids inf-inf -> NaN hazards)
_VMEM_LIMIT_BYTES = 48 * 1024 * 1024  # fits v7x's 64 MiB/TC with headroom; fine on v5e/v6e


# ----------------------------------------------------------------------------
# Stage 1: fused QKV projection, written head-major.
# ----------------------------------------------------------------------------
def _qkv_proj_kernel(x_ref, w_ref, q_ref, k_ref, v_ref, *, num_heads, head_dim, d_out):
    """x_ref: (1, TQ, d_in); w_ref: (d_in, 3*d_out) bf16;
    q/k/v_ref: (1, H, TQ, hd) bf16 (head-major outputs)."""
    x = x_ref[0].astype(jnp.bfloat16)                                   # (TQ, d_in)
    # One fused MXU matmul with N = 3*d_out (amortizes start/drain vs 3 separate dots).
    y = jnp.dot(x, w_ref[...], preferred_element_type=jnp.float32)     # (TQ, 3*d_out)
    # Static unroll over heads: write the head-major layout stage 2 consumes directly.
    for h in range(num_heads):
        lo = h * head_dim
        hi = lo + head_dim
        q_ref[0, h] = y[:, lo:hi].astype(jnp.bfloat16)
        k_ref[0, h] = y[:, d_out + lo:d_out + hi].astype(jnp.bfloat16)
        v_ref[0, h] = y[:, 2 * d_out + lo:2 * d_out + hi].astype(jnp.bfloat16)


# ----------------------------------------------------------------------------
# Stage 2: flash-style causal attention + fused output projection.
# ----------------------------------------------------------------------------
def _flash_attn_kernel(q_ref, k_ref, v_ref, wo_ref, bo_ref, o_ref,
                       m_sc, l_sc, acc_sc, *, scale, q_tile, kv_tile):
    """q_ref: (1, H, TQ, hd); k/v_ref: (1, H, TK, hd); wo_ref: (H, hd, d_out) bf16;
    bo_ref: (1, d_out) f32; o_ref: (1, TQ, d_out);
    scratch: m/l (H, TQ, 1) f32, acc (H, TQ, hd) f32."""
    qi = pl.program_id(1)
    ki = pl.program_id(2)
    nk = pl.num_programs(2)

    @pl.when(ki == 0)
    def _init():
        m_sc[...] = jnp.full_like(m_sc, _NEG_BIG)
        l_sc[...] = jnp.zeros_like(l_sc)
        acc_sc[...] = jnp.zeros_like(acc_sc)

    q_start = qi * q_tile
    k_start = ki * kv_tile

    # Skip KV tiles strictly above the causal diagonal (fully masked).
    @pl.when(k_start < q_start + q_tile)
    def _compute():
        q = q_ref[0]                                                    # (H, TQ, hd) bf16
        k = k_ref[0]                                                    # (H, TK, hd) bf16
        v = v_ref[0]                                                    # (H, TK, hd) bf16

        # Head-batched scores, contracting head_dim directly (no explicit kh.T).
        s = jnp.einsum("hqd,hkd->hqk", q, k,
                       preferred_element_type=jnp.float32) * scale      # (H, TQ, TK) f32

        row = q_start + jax.lax.broadcasted_iota(jnp.int32, (q_tile, kv_tile), 0)
        col = k_start + jax.lax.broadcasted_iota(jnp.int32, (q_tile, kv_tile), 1)
        s = jnp.where((col <= row)[None, :, :], s, _NEG_BIG)

        # Online softmax update.
        m_prev = m_sc[...]                                              # (H, TQ, 1)
        m_new = jnp.maximum(m_prev, jnp.max(s, axis=-1, keepdims=True))
        alpha = jnp.exp(m_prev - m_new)
        p = jnp.exp(s - m_new)                                          # (H, TQ, TK)
        l_sc[...] = alpha * l_sc[...] + jnp.sum(p, axis=-1, keepdims=True)
        acc_sc[...] = alpha * acc_sc[...] + jnp.einsum(
            "hqk,hkd->hqd", p.astype(jnp.bfloat16), v,
            preferred_element_type=jnp.float32)                         # (H, TQ, hd)
        m_sc[...] = m_new

    @pl.when(ki == nk - 1)
    def _finalize():
        # Normalize AFTER the p@v matmul (T*hd multiplies, not T*T); approx recip -> EUP.
        inv_l = pl.reciprocal(l_sc[...], approx=True)                   # (H, TQ, 1)
        ctx = (acc_sc[...] * inv_l).astype(jnp.bfloat16)                # (H, TQ, hd)
        # Output projection fused: per-head partials, summed over heads (no lane concat).
        part = jnp.einsum("hqd,hdo->hqo", ctx, wo_ref[...],
                          preferred_element_type=jnp.float32)           # (H, TQ, d_out)
        out = jnp.sum(part, axis=0) + bo_ref[...]                       # (TQ, d_out)
        o_ref[0] = out.astype(o_ref.dtype)


# ----------------------------------------------------------------------------
# Wrapper
# ----------------------------------------------------------------------------
def multi_head_attention(x, wq, wk, wv, wo, bo, *, num_heads, q_tile=128, kv_tile=128):
    """x: (B, T, d_in); wq/wk/wv: (d_out, d_in); wo: (d_out, d_out); bo: (d_out,).

    Matches the PyTorch module's eval-mode forward (causal MHA + out_proj)."""
    B, T, d_in = x.shape
    d_out = wq.shape[0]
    assert d_out % num_heads == 0
    head_dim = d_out // num_heads

    TQ = min(q_tile, T)
    TK = min(kv_tile, T)
    # TODO(synk): ragged T (non-divisible by tile) would need masked padding of K tiles.
    assert T % TQ == 0 and T % TK == 0, "T must be divisible by the tile sizes"
    nq = T // TQ
    nk = T // TK

    # Weight prep (host/XLA side): fused QKV weight, head-major out_proj weight, bf16 MXU operands.
    w_qkv = jnp.concatenate([wq.T, wk.T, wv.T], axis=1).astype(jnp.bfloat16)   # (d_in, 3*d_out)
    wo_heads = wo.T.reshape(num_heads, head_dim, d_out).astype(jnp.bfloat16)   # (H, hd, d_out)
    bo_2d = bo.reshape(1, d_out).astype(jnp.float32)

    # ---------------- Stage 1: fused QKV projection ----------------
    qkv_shape = jax.ShapeDtypeStruct((B, num_heads, T, head_dim), jnp.bfloat16)
    proj_kernel = functools.partial(_qkv_proj_kernel, num_heads=num_heads,
                                    head_dim=head_dim, d_out=d_out)
    q_h, k_h, v_h = pl.pallas_call(
        proj_kernel,
        out_shape=(qkv_shape, qkv_shape, qkv_shape),
        grid_spec=pltpu.PrefetchScalarGridSpec(
            num_scalar_prefetch=0,
            grid=(B, nq),
            in_specs=[
                pl.BlockSpec((1, TQ, d_in), lambda b, i: (b, i, 0)),
                pl.BlockSpec((d_in, 3 * d_out), lambda b, i: (0, 0)),
            ],
            out_specs=[
                pl.BlockSpec((1, num_heads, TQ, head_dim), lambda b, i: (b, 0, i, 0)),
                pl.BlockSpec((1, num_heads, TQ, head_dim), lambda b, i: (b, 0, i, 0)),
                pl.BlockSpec((1, num_heads, TQ, head_dim), lambda b, i: (b, 0, i, 0)),
            ],
        ),
        compiler_params=pltpu.CompilerParams(
            dimension_semantics=("parallel", "parallel"),
            vmem_limit_bytes=_VMEM_LIMIT_BYTES),
    )(x, w_qkv)

    # ---------------- Stage 2: flash attention + out_proj ----------------
    attn_kernel = functools.partial(_flash_attn_kernel,
                                    scale=1.0 / math.sqrt(head_dim),
                                    q_tile=TQ, kv_tile=TK)
    out = pl.pallas_call(
        attn_kernel,
        out_shape=jax.ShapeDtypeStruct((B, T, d_out), x.dtype),
        grid_spec=pltpu.PrefetchScalarGridSpec(
            num_scalar_prefetch=0,
            grid=(B, nq, nk),
            in_specs=[
                pl.BlockSpec((1, num_heads, TQ, head_dim), lambda b, qi, ki: (b, 0, qi, 0)),
                pl.BlockSpec((1, num_heads, TK, head_dim), lambda b, qi, ki: (b, 0, ki, 0)),
                pl.BlockSpec((1, num_heads, TK, head_dim), lambda b, qi, ki: (b, 0, ki, 0)),
                pl.BlockSpec((num_heads, head_dim, d_out), lambda b, qi, ki: (0, 0, 0)),
                pl.BlockSpec((1, d_out), lambda b, qi, ki: (0, 0)),
            ],
            out_specs=pl.BlockSpec((1, TQ, d_out), lambda b, qi, ki: (b, qi, 0)),
            scratch_shapes=[
                pltpu.VMEM((num_heads, TQ, 1), jnp.float32),          # m (running max)
                pltpu.VMEM((num_heads, TQ, 1), jnp.float32),          # l (running denom)
                pltpu.VMEM((num_heads, TQ, head_dim), jnp.float32),   # acc (unnormalized ctx)
            ],
        ),
        compiler_params=pltpu.CompilerParams(
            dimension_semantics=("parallel", "parallel", "arbitrary"),
            vmem_limit_bytes=_VMEM_LIMIT_BYTES),
    )(q_h, k_h, v_h, wo_heads, bo_2d)
    return out


# ----------------------------------------------------------------------------
# Pure-JAX reference (mirrors the PyTorch forward, eval-mode dropout)
# ----------------------------------------------------------------------------
def _reference(x, wq, wk, wv, wo, bo, *, num_heads):
    B, T, d_in = x.shape
    d_out = wq.shape[0]
    hd = d_out // num_heads
    q = x @ wq.T
    k = x @ wk.T
    v = x @ wv.T
    q = q.reshape(B, T, num_heads, hd).transpose(0, 2, 1, 3)
    k = k.reshape(B, T, num_heads, hd).transpose(0, 2, 1, 3)
    v = v.reshape(B, T, num_heads, hd).transpose(0, 2, 1, 3)
    scores = jnp.einsum("bhqd,bhkd->bhqk", q, k)
    mask = jnp.triu(jnp.ones((T, T), dtype=bool), k=1)
    scores = jnp.where(mask[None, None], -jnp.inf, scores)
    attn = jax.nn.softmax(scores / math.sqrt(hd), axis=-1)
    ctx = jnp.einsum("bhqk,bhkd->bhqd", attn, v).transpose(0, 2, 1, 3).reshape(B, T, d_out)
    return ctx @ wo.T + bo


if __name__ == "__main__":
    # Small shapes consistent with the module's forward:
    # batch=2, seq (num_tokens)=8, d_in=32, d_out=32, num_heads=4, head_dim=8
    B, T, d_in, d_out, num_heads = 2, 8, 32, 32, 4

    key = jax.random.PRNGKey(0)
    kx, kq, kk, kv, ko, kb = jax.random.split(key, 6)

    x = jax.random.normal(kx, (B, T, d_in), dtype=jnp.float32)
    # deterministic synthetic parameters (nn.Linear weight shape: (out, in))
    wq = jax.random.normal(kq, (d_out, d_in), dtype=jnp.float32) * 0.1
    wk = jax.random.normal(kk, (d_out, d_in), dtype=jnp.float32) * 0.1
    wv = jax.random.normal(kv, (d_out, d_in), dtype=jnp.float32) * 0.1
    wo = jax.random.normal(ko, (d_out, d_out), dtype=jnp.float32) * 0.1
    bo = jax.random.normal(kb, (d_out,), dtype=jnp.float32) * 0.1

    out = multi_head_attention(x, wq, wk, wv, wo, bo, num_heads=num_heads)
    out = jax.block_until_ready(out)

    ref = _reference(x, wq, wk, wv, wo, bo, num_heads=num_heads)
    assert out.shape == (B, T, d_out)
    # Tolerance accounts for bf16 MXU operands (f32 accumulation) vs the f32 reference.
    assert jnp.allclose(out, ref, atol=5e-2, rtol=5e-2), (
        f"mismatch vs JAX reference, max abs diff = {float(jnp.max(jnp.abs(out - ref)))}")

    print("KERNEL_OK")
</pallas_src>

<mosaic_0001>
module attributes {stable_mosaic.version = 11 : i64} {
  func.func @_qkv_proj_kernel(%arg0: i32, %arg1: i32, %arg2: memref<1x8x32xf32, #tpu.memory_space<vmem>>, %arg3: memref<32x96xbf16, #tpu.memory_space<vmem>>, %arg4: memref<1x4x8x8xbf16, #tpu.memory_space<vmem>>, %arg5: memref<1x4x8x8xbf16, #tpu.memory_space<vmem>>, %arg6: memref<1x4x8x8xbf16, #tpu.memory_space<vmem>>) attributes {dimension_semantics = [#tpu.dimension_semantics<parallel>, #tpu.dimension_semantics<parallel>], iteration_bounds = array<i64: 2, 1>, scalar_prefetch = 0 : i64, scratch_operands = 0 : i64, tpu.core_type = #tpu.core_type<tc>, window_params = [{transform_indices = @transform_0, window_bounds = array<i64: 1, 8, 32>}, {pipeline_mode = #tpu.pipeline_mode<synchronous>, transform_indices = @transform_1, window_bounds = array<i64: 32, 96>}, {transform_indices = @transform_2, window_bounds = array<i64: 1, 4, 8, 8>}, {transform_indices = @transform_3, window_bounds = array<i64: 1, 4, 8, 8>}, {transform_indices = @transform_4, window_bounds = array<i64: 1, 4, 8, 8>}]} {
    %c0 = arith.constant 0 : index
    %c0_0 = arith.constant 0 : index
    %c0_1 = arith.constant 0 : index
    %0 = vector.load %arg2[%c0, %c0_0, %c0_1] : memref<1x8x32xf32, #tpu.memory_space<vmem>>, vector<1x8x32xf32>
    %1 = vector.shape_cast %0 : vector<1x8x32xf32> to vector<8x32xf32>
    %2 = arith.truncf %1 : vector<8x32xf32> to vector<8x32xbf16>
    %c0_2 = arith.constant 0 : index
    %c0_3 = arith.constant 0 : index
    %3 = vector.load %arg3[%c0_2, %c0_3] : memref<32x96xbf16, #tpu.memory_space<vmem>>, vector<32x96xbf16>
    %cst = arith.constant dense<0.000000e+00> : vector<8x96xf32>
    %4 = tpu.matmul %2, %3, %cst {dimension_numbers = #tpu.dot_dimension_numbers<[1], [0], [0], [1], [0, 0, 1, 1], [], []>} : vector<8x32xbf16>, vector<32x96xbf16>, vector<8x96xf32> -> vector<8x96xf32>
    %5 = vector.extract_strided_slice %4 {offsets = [0, 0], sizes = [8, 8], strides = [1, 1]} : vector<8x96xf32> to vector<8x8xf32>
    %6 = arith.truncf %5 : vector<8x8xf32> to vector<8x8xbf16>
    %c0_4 = arith.constant 0 : index
    %c0_5 = arith.constant 0 : index
    %c0_6 = arith.constant 0 : index
    %c0_7 = arith.constant 0 : index
    %7 = vector.load %arg4[%c0_4, %c0_5, %c0_6, %c0_7] : memref<1x4x8x8xbf16, #tpu.memory_space<vmem>>, vector<1x1x8x8xbf16>
    %8 = vector.shape_cast %7 : vector<1x1x8x8xbf16> to vector<8x8xbf16>
    %9 = vector.shape_cast %6 : vector<8x8xbf16> to vector<1x1x8x8xbf16>
    tpu.vector_store %arg4[%c0_4, %c0_5, %c0_6, %c0_7], %9 {strides = array<i32>} : memref<1x4x8x8xbf16, #tpu.memory_space<vmem>>, vector<1x1x8x8xbf16>,
    %10 = vector.extract_strided_slice %4 {offsets = [0, 32], sizes = [8, 8], strides = [1, 1]} : vector<8x96xf32> to vector<8x8xf32>
    %11 = arith.truncf %10 : vector<8x8xf32> to vector<8x8xbf16>
    %c0_8 = arith.constant 0 : index
    %c0_9 = arith.constant 0 : index
    %c0_10 = arith.constant 0 : index
    %c0_11 = arith.constant 0 : index
    %12 = vector.load %arg5[%c0_8, %c0_9, %c0_10, %c0_11] : memref<1x4x8x8xbf16, #tpu.memory_space<vmem>>, vector<1x1x8x8xbf16>
    %13 = vector.shape_cast %12 : vector<1x1x8x8xbf16> to vector<8x8xbf16>
    %14 = vector.shape_cast %11 : vector<8x8xbf16> to vector<1x1x8x8xbf16>
    tpu.vector_store %arg5[%c0_8, %c0_9, %c0_10, %c0_11], %14 {strides = array<i32>} : memref<1x4x8x8xbf16, #tpu.memory_space<vmem>>, vector<1x1x8x8xbf16>,
    %15 = vector.extract_strided_slice %4 {offsets = [0, 64], sizes = [8, 8], strides = [1, 1]} : vector<8x96xf32> to vector<8x8xf32>
    %16 = arith.truncf %15 : vector<8x8xf32> to vector<8x8xbf16>
    %c0_12 = arith.constant 0 : index
    %c0_13 = arith.constant 0 : index
    %c0_14 = arith.constant 0 : index
    %c0_15 = arith.constant 0 : index
    %17 = vector.load %arg6[%c0_12, %c0_13, %c0_14, %c0_15] : memref<1x4x8x8xbf16, #tpu.memory_space<vmem>>, vector<1x1x8x8xbf16>
    %18 = vector.shape_cast %17 : vector<1x1x8x8xbf16> to vector<8x8xbf16>
    %19 = vector.shape_cast %16 : vector<8x8xbf16> to vector<1x1x8x8xbf16>
    tpu.vector_store %arg6[%c0_12, %c0_13, %c0_14, %c0_15], %19 {strides = array<i32>} : memref<1x4x8x8xbf16, #tpu.memory_space<vmem>>, vector<1x1x8x8xbf16>,
    %20 = vector.extract_strided_slice %4 {offsets = [0, 8], sizes = [8, 8], strides = [1, 1]} : vector<8x96xf32> to vector<8x8xf32>
    %21 = arith.truncf %20 : vector<8x8xf32> to vector<8x8xbf16>
    %c0_16 = arith.constant 0 : index
    %c1 = arith.constant 1 : index
    %c0_17 = arith.constant 0 : index
    %c0_18 = arith.constant 0 : index
    %22 = vector.load %arg4[%c0_16, %c1, %c0_17, %c0_18] : memref<1x4x8x8xbf16, #tpu.memory_space<vmem>>, vector<1x1x8x8xbf16>
    %23 = vector.shape_cast %22 : vector<1x1x8x8xbf16> to vector<8x8xbf16>
    %24 = vector.shape_cast %21 : vector<8x8xbf16> to vector<1x1x8x8xbf16>
    tpu.vector_store %arg4[%c0_16, %c1, %c0_17, %c0_18], %24 {strides = array<i32>} : memref<1x4x8x8xbf16, #tpu.memory_space<vmem>>, vector<1x1x8x8xbf16>,
    %25 = vector.extract_strided_slice %4 {offsets = [0, 40], sizes = [8, 8], strides = [1, 1]} : vector<8x96xf32> to vector<8x8xf32>
    %26 = arith.truncf %25 : vector<8x8xf32> to vector<8x8xbf16>
    %c0_19 = arith.constant 0 : index
    %c1_20 = arith.constant 1 : index
    %c0_21 = arith.constant 0 : index
    %c0_22 = arith.constant 0 : index
    %27 = vector.load %arg5[%c0_19, %c1_20, %c0_21, %c0_22] : memref<1x4x8x8xbf16, #tpu.memory_space<vmem>>, vector<1x1x8x8xbf16>
    %28 = vector.shape_cast %27 : vector<1x1x8x8xbf16> to vector<8x8xbf16>
    %29 = vector.shape_cast %26 : vector<8x8xbf16> to vector<1x1x8x8xbf16>
    tpu.vector_store %arg5[%c0_19, %c1_20, %c0_21, %c0_22], %29 {strides = array<i32>} : memref<1x4x8x8xbf16, #tpu.memory_space<vmem>>, vector<1x1x8x8xbf16>,
    %30 = vector.extract_strided_slice %4 {offsets = [0, 72], sizes = [8, 8], strides = [1, 1]} : vector<8x96xf32> to vector<8x8xf32>
    %31 = arith.truncf %30 : vector<8x8xf32> to vector<8x8xbf16>
    %c0_23 = arith.constant 0 : index
    %c1_24 = arith.constant 1 : index
    %c0_25 = arith.constant 0 : index
    %c0_26 = arith.constant 0 : index
    %32 = vector.load %arg6[%c0_23, %c1_24, %c0_25, %c0_26] : memref<1x4x8x8xbf16, #tpu.memory_space<vmem>>, vector<1x1x8x8xbf16>
    %33 = vector.shape_cast %32 : vector<1x1x8x8xbf16> to vector<8x8xbf16>
    %34 = vector.shape_cast %31 : vector<8x8xbf16> to vector<1x1x8x8xbf16>
    tpu.vector_store %arg6[%c0_23, %c1_24, %c0_25, %c0_26], %34 {strides = array<i32>} : memref<1x4x8x8xbf16, #tpu.memory_space<vmem>>, vector<1x1x8x8xbf16>,
    %35 = vector.extract_strided_slice %4 {offsets = [0, 16], sizes = [8, 8], strides = [1, 1]} : vector<8x96xf32> to vector<8x8xf32>
    %36 = arith.truncf %35 : vector<8x8xf32> to vector<8x8xbf16>
    %c0_27 = arith.constant 0 : index
    %c2 = arith.constant 2 : index
    %c0_28 = arith.constant 0 : index
    %c0_29 = arith.constant 0 : index
    %37 = vector.load %arg4[%c0_27, %c2, %c0_28, %c0_29] : memref<1x4x8x8xbf16, #tpu.memory_space<vmem>>, vector<1x1x8x8xbf16>
    %38 = vector.shape_cast %37 : vector<1x1x8x8xbf16> to vector<8x8xbf16>
    %39 = vector.shape_cast %36 : vector<8x8xbf16> to vector<1x1x8x8xbf16>
    tpu.vector_store %arg4[%c0_27, %c2, %c0_28, %c0_29], %39 {strides = array<i32>} : memref<1x4x8x8xbf16, #tpu.memory_space<vmem>>, vector<1x1x8x8xbf16>,
    %40 = vector.extract_strided_slice %4 {offsets = [0, 48], sizes = [8, 8], strides = [1, 1]} : vector<8x96xf32> to vector<8x8xf32>
    %41 = arith.truncf %40 : vector<8x8xf32> to vector<8x8xbf16>
    %c0_30 = arith.constant 0 : index
    %c2_31 = arith.constant 2 : index
    %c0_32 = arith.constant 0 : index
    %c0_33 = arith.constant 0 : index
    %42 = vector.load %arg5[%c0_30, %c2_31, %c0_32, %c0_33] : memref<1x4x8x8xbf16, #tpu.memory_space<vmem>>, vector<1x1x8x8xbf16>
    %43 = vector.shape_cast %42 : vector<1x1x8x8xbf16> to vector<8x8xbf16>
    %44 = vector.shape_cast %41 : vector<8x8xbf16> to vector<1x1x8x8xbf16>
    tpu.vector_store %arg5[%c0_30, %c2_31, %c0_32, %c0_33], %44 {strides = array<i32>} : memref<1x4x8x8xbf16, #tpu.memory_space<vmem>>, vector<1x1x8x8xbf16>,
    %45 = vector.extract_strided_slice %4 {offsets = [0, 80], sizes = [8, 8], strides = [1, 1]} : vector<8x96xf32> to vector<8x8xf32>
    %46 = arith.truncf %45 : vector<8x8xf32> to vector<8x8xbf16>
    %c0_34 = arith.constant 0 : index
    %c2_35 = arith.constant 2 : index
    %c0_36 = arith.constant 0 : index
    %c0_37 = arith.constant 0 : index
    %47 = vector.load %arg6[%c0_34, %c2_35, %c0_36, %c0_37] : memref<1x4x8x8xbf16, #tpu.memory_space<vmem>>, vector<1x1x8x8xbf16>
    %48 = vector.shape_cast %47 : vector<1x1x8x8xbf16> to vector<8x8xbf16>
    %49 = vector.shape_cast %46 : vector<8x8xbf16> to vector<1x1x8x8xbf16>
    tpu.vector_store %arg6[%c0_34, %c2_35, %c0_36, %c0_37], %49 {strides = array<i32>} : memref<1x4x8x8xbf16, #tpu.memory_space<vmem>>, vector<1x1x8x8xbf16>,
    %50 = vector.extract_strided_slice %4 {offsets = [0, 24], sizes = [8, 8], strides = [1, 1]} : vector<8x96xf32> to vector<8x8xf32>
    %51 = arith.truncf %50 : vector<8x8xf32> to vector<8x8xbf16>
    %c0_38 = arith.constant 0 : index
    %c3 = arith.constant 3 : index
    %c0_39 = arith.constant 0 : index
    %c0_40 = arith.constant 0 : index
    %52 = vector.load %arg4[%c0_38, %c3, %c0_39, %c0_40] : memref<1x4x8x8xbf16, #tpu.memory_space<vmem>>, vector<1x1x8x8xbf16>
    %53 = vector.shape_cast %52 : vector<1x1x8x8xbf16> to vector<8x8xbf16>
    %54 = vector.shape_cast %51 : vector<8x8xbf16> to vector<1x1x8x8xbf16>
    tpu.vector_store %arg4[%c0_38, %c3, %c0_39, %c0_40], %54 {strides = array<i32>} : memref<1x4x8x8xbf16, #tpu.memory_space<vmem>>, vector<1x1x8x8xbf16>,
    %55 = vector.extract_strided_slice %4 {offsets = [0, 56], sizes = [8, 8], strides = [1, 1]} : vector<8x96xf32> to vector<8x8xf32>
    %56 = arith.truncf %55 : vector<8x8xf32> to vector<8x8xbf16>
    %c0_41 = arith.constant 0 : index
    %c3_42 = arith.constant 3 : index
    %c0_43 = arith.constant 0 : index
    %c0_44 = arith.constant 0 : index
    %57 = vector.load %arg5[%c0_41, %c3_42, %c0_43, %c0_44] : memref<1x4x8x8xbf16, #tpu.memory_space<vmem>>, vector<1x1x8x8xbf16>
    %58 = vector.shape_cast %57 : vector<1x1x8x8xbf16> to vector<8x8xbf16>
    %59 = vector.shape_cast %56 : vector<8x8xbf16> to vector<1x1x8x8xbf16>
    tpu.vector_store %arg5[%c0_41, %c3_42, %c0_43, %c0_44], %59 {strides = array<i32>} : memref<1x4x8x8xbf16, #tpu.memory_space<vmem>>, vector<1x1x8x8xbf16>,
    %60 = vector.extract_strided_slice %4 {offsets = [0, 88], sizes = [8, 8], strides = [1, 1]} : vector<8x96xf32> to vector<8x8xf32>
    %61 = arith.truncf %60 : vector<8x8xf32> to vector<8x8xbf16>
    %c0_45 = arith.constant 0 : index
    %c3_46 = arith.constant 3 : index
    %c0_47 = arith.constant 0 : index
    %c0_48 = arith.constant 0 : index
    %62 = vector.load %arg6[%c0_45, %c3_46, %c0_47, %c0_48] : memref<1x4x8x8xbf16, #tpu.memory_space<vmem>>, vector<1x1x8x8xbf16>
    %63 = vector.shape_cast %62 : vector<1x1x8x8xbf16> to vector<8x8xbf16>
    %64 = vector.shape_cast %61 : vector<8x8xbf16> to vector<1x1x8x8xbf16>
    tpu.vector_store %arg6[%c0_45, %c3_46, %c0_47, %c0_48], %64 {strides = array<i32>} : memref<1x4x8x8xbf16, #tpu.memory_space<vmem>>, vector<1x1x8x8xbf16>,
    return
  }
  func.func @transform_0(%arg0: i32, %arg1: i32) -> (i32, i32, i32) {
    %c0_i32 = arith.constant 0 : i32
    %c0_i32_0 = arith.constant 0 : i32
    return %arg0, %arg1, %c0_i32 : i32, i32, i32
  }
  func.func @transform_1(%arg0: i32, %arg1: i32) -> (i32, i32) {
    %c0_i32 = arith.constant 0 : i32
    %c0_i32_0 = arith.constant 0 : i32
    %c0_i32_1 = arith.constant 0 : i32
    return %c0_i32, %c0_i32_0 : i32, i32
  }
  func.func @transform_2(%arg0: i32, %arg1: i32) -> (i32, i32, i32, i32) {
    %c0_i32 = arith.constant 0 : i32
    %c0_i32_0 = arith.constant 0 : i32
    %c0_i32_1 = arith.constant 0 : i32
    return %arg0, %c0_i32, %arg1, %c0_i32_0 : i32, i32, i32, i32
  }
  func.func @transform_3(%arg0: i32, %arg1: i32) -> (i32, i32, i32, i32) {
    %c0_i32 = arith.constant 0 : i32
    %c0_i32_0 = arith.constant 0 : i32
    %c0_i32_1 = arith.constant 0 : i32
    return %arg0, %c0_i32, %arg1, %c0_i32_0 : i32, i32, i32, i32
  }
  func.func @transform_4(%arg0: i32, %arg1: i32) -> (i32, i32, i32, i32) {
    %c0_i32 = arith.constant 0 : i32
    %c0_i32_0 = arith.constant 0 : i32
    %c0_i32_1 = arith.constant 0 : i32
    return %arg0, %c0_i32, %arg1, %c0_i32_0 : i32, i32, i32, i32
  }
}

</mosaic_0001>

<bundles_post_ra>
// kernel: tpu_custom_call.1
= control target key start
LH: loop header
LB: loop body
LE: loop exit
PB: predicated region body
PF: predicated region fallthrough
CT: control target
= control target key end

     0   :  { %s1289_s0 = inlined_call_operand.hbm [shape: f32[2,8,32], index: 0, kind: input, shape index: {}]   ;;  %s1290_s1 = inlined_call_operand.hbm [shape: bf16[32,96], index: 1, kind: input, shape index: {}]   ;;  %s1291_s2 = inlined_call_operand.hbm [shape: bf16[2,4,8,8], index: 2, kind: output, shape index: {0}]   ;;  %s1292_s3 = inlined_call_operand.hbm [shape: bf16[2,4,8,8], index: 3, kind: output, shape index: {1}]   ;;  %s1293_s4 = inlined_call_operand.hbm [shape: bf16[2,4,8,8], index: 4, kind: output, shape index: {2}]  }
   0x1   :  { %1296 = sst [smem:[#allocation15_spill]] %s1290_s1 }
   0x2   :  { %10 = vsyncpa [#allocation3], 0 }
   0x3   :  { %12 = vsyncpa [#allocation3 + $0x1], 0 }
   0x4   :  { %13 = vsyncpa [#allocation6], 0 }
   0x5   :  { %14 = vsyncpa [#allocation4], 0 }
   0x6   :  { %16 = vsyncpa [#allocation4 + $0x1], 0 }
   0x7   :  { %17 = vsyncpa [#allocation9], 0 }
   0x8   :  { %19 = vsyncpa [#allocation9 + $0x1], 0  ;;  %s1002_s15 = smov 0   ;;  %s1004_s16 = smov 0  }
   0x9   :  { %s1006_s17 = smov 0   ;;  %s1008_s18 = smov 0  }
   0xa   :  { %s1010_s19 = smov 0   ;;  %s1012_s20 = smov 0  }
   0xb LB: > { %s1033_s21 = sadd.s32 4294967295, %s954_s20   ;;  %s1294_s22 = sadd.s32 4294967294, %s954_s20   ;;  %s954_s20 = sphi %s1012_s20, %s25_s20   ;;  %s950_s19 = sphi %s1010_s19, %s1315_s19   ;;  %s946_s18 = sphi %s1008_s18, %s1314_s18   ;;  %s942_s17 = sphi %s1006_s17, %s1313_s17   ;;  %s938_s16 = sphi %s1004_s16, %s1312_s16   ;;  %s934_s15 = sphi %s1002_s15, %s1311_s15  }
   0xc   : > { %p59_p0 = scmp.ne.s32.totalorder %s938_s16, %s934_s15  ;;  %p1295_p1 = scmp.eq.s32.totalorder %s1033_s21, 0 }
   0xd   : > { %p112_p3 = scmp.eq.s32.totalorder %s1294_s22, 1  ;;  %p609_p5 = scmp.ge.s32.totalorder %s954_s20, 1 }
   0xe   : > { %p1044_p4 = por %p1295_p1, %p59_p0  ;;  %p175_p7 = scmp.lt.s32.totalorder %s954_s20, 3 }
   0xf   : > { %p1049_p6 = por %p112_p3, %p59_p0  ;;  %s956_s26 = smov [#allocation5]  }
  0x10   : > { %p1054_p8 = pnand %p609_p5, %p175_p7  ;;  %s187_s27 = sshll.u32 %s956_s26, 4  ;;  %s188_s27 = int_to_ptr.vmem [resolvable:$true] %s187_s27 }
  0x11   : > { %s1298_s24 = scalar_select %p1049_p6, 1, 0 }
  0x12   : > { %p671_p9 = pneg %p1054_p8  ;;  %s37_s29 = sadd.s32 1, %s950_s19 }
  0x13   : > { %s771_s30 = scalar_lea.vmem %s188_s27, 256  ;;  %p779_p5 = scmp.lt.s32.totalorder %s188_s27, %s188_s27 }
  0x14   : > { %p1063_p11 = pnand %p671_p9, %p1295_p1  ;;  %p772_p13 = scmp.ne.s32.totalorder %s188_s27, %s771_s30 }
  0x15   : > { %p780_p7 = scmp.lt.s32.totalorder %s771_s30, %s771_s30 }
  0x16   : > { %p762_p12 = pneg %p1063_p11 }
  0x17   : > { %p781_p2 = por %p780_p7, %p779_p5 }
  0x18   : > { %p774_p0 = pnand %p772_p13, %p762_p12 }
  0x1a   : > { %p775_p3 = pneg %p774_p0 }
  0x1c   : > { %p782_p6 = pnand %p781_p2, %p775_p3 }
  0x1e   : > { %785 = shalt.err (!%p782_p6)
}
  0x1f   : > { %s957_s5 = smov 64   ;;  %s958_s6 = smov 4  }
  0x20   : > { %s1301_s1 = sld [smem:[#allocation15_spill]]  ;;  %p39_p2 = scmp.ge.s32.totalorder %s37_s29, 2 }
  0x21   : > { %s46_s9 = sadd.s32 1, %s942_s17  ;;  %p53_p6 = scmp.ne.s32.totalorder %s942_s17, %s938_s16 }
  0x22   : > { %p54_p9 = scmp.eq.s32.totalorder %s954_s20, 0  ;;  %s1317_s29 = smov (%p39_p2, %s37_s29), 0 }
  0x23   : > { %p1303_p13 = scmp.eq.s32.totalorder %s1033_s21, 1  ;;  %s41_s12 = ssub.s32 %s950_s19, %s1317_s29 }
  0x24   : > { %p1081_p12 = por %p54_p9, %p53_p6  ;;  %p690_p3 = scmp.lt.s32.totalorder %s954_s20, 2 }
  0x25   : > { %p1087_p0 = por %p1303_p13, %p53_p6  ;;  %s201_s13 = sand.u32 1, %s942_s17  }
  0x26   : > { %674 = dma.hbm_to_vmem [thread:$0]  (!%p1063_p11), %s1301_s1, 256, %s188_s27, [#allocation6], %s957_s5, %s957_s5, %s958_s6  }
  0x27   : > { %p44_p11 = scmp.eq.s32.totalorder %s41_s12, 0  ;;  %s612_s14 = sshll.u32 %s201_s13, 3 }
  0x28   : > { %s613_s27 = sshll.u32 %s950_s19, 7  ;;  %s205_s6 = scalar_lea.vmem [#allocation2], %s612_s14 }
  0x29   : > { %s1096_s26 = scalar_select %p44_p11, %s942_s17, %s46_s9  }
  0x2a   : > { %s211_s5 = scalar_lea.hbm %s1289_s0, %s613_s27  ;;  %s213_s7 = sshll.u32 %s205_s6, 4  ;;  %s214_s7 = int_to_ptr.vmem [resolvable:$true] %s213_s7 }
  0x2b   : > { %p1104_p5 = pnand %p690_p3, %p1081_p12  ;;  %s202_s22 = scalar_lea.sflag [#allocation3], %s201_s13 }
  0x2c   : > { %s799_s12 = scalar_lea.vmem %s214_s7, 128  ;;  %s959_s9 = smov [#allocation2]  }
  0x2d   : > { %p788_p7 = pneg %p1104_p5  ;;  %p800_p2 = scmp.ne.s32.totalorder %s214_s7, %s799_s12 }
  0x2e   : > { %s804_s1 = sshll.u32 %s959_s9, 4  ;;  %s805_s1 = int_to_ptr.vmem [resolvable:$false] %s804_s1 }
  0x2f   : > { %p802_p6 = pnand %p800_p2, %p788_p7  ;;  %s806_s27 = scalar_lea.vmem %s805_s1, 256 }
  0x30   : > { %p807_p13 = scmp.lt.s32.totalorder %s214_s7, %s805_s1  ;;  %p808_p11 = scmp.lt.s32.totalorder %s806_s27, %s799_s12 }
  0x31   : > { %p803_p9 = pneg %p802_p6 }
  0x32   : > { %p809_p10 = por %p808_p11, %p807_p13 }
  0x34   : > { %p810_p1 = pnand %p809_p10, %p803_p9 }
  0x36   : > { %813 = shalt.err (!%p810_p1)
}
  0x37   : > { %678 = dma.hbm_to_vmem [thread:$0]  (!%p1104_p5), %s211_s5, 128, %s214_s7, %s202_s22  }
  0x38   : > { %222 = sbr.rel (%p1054_p8) target bundleno = 447 (0x1bf), region = 28  ;;  %s1115_s10 = sand.u32 (!%p1054_p8), 1, %s938_s16  }
  0x39   : > { %s615_s13 = sshll.u32 (!%p1054_p8), %s1115_s10, 3  ;;  %s225_s14 = scalar_lea.sflag (!%p1054_p8), [#allocation3], %s1115_s10 }
  0x3a   : > { %s228_s28 = scalar_lea.vmem (!%p1054_p8), [#allocation2], %s615_s13 }
  0x3d   : > { %917 = dma.done.wait (%p1044_p4), %s225_s14, 128  }
  0x3e   : > { %919 = vsyncadd (%p1044_p4), %s225_s14, 4294967168  ;;  %p1306_p1 = scmp.eq.s32.totalorder %s1033_s21, 0 }
  0x40   : > { %921 = dma.done.wait (%p1306_p1), [#allocation6], 256   ;;  %p1307_p10 = pmov %p1306_p1 }
  0x41   : > { %v960_v0 = vmov 0.0   ;;  %vm961_vm0 = vmmov 0   ;;  %v758_v1 = vld [vmem:[#allocation5 + $0x8] sm:$0xff]   ;;  %v759_v2 = vld [vmem:[#allocation5] sm:$0xff]   ;;  %v268_v3 = vld [vmem:[%s228_s28] sm:$0xff]  ;;  %vm286_vm1 = vcmask 261120  }
  0x42   : > { %923 = vsyncadd (%p1307_p10), [#allocation6], 4294967040  ;;  %651 = vmatprep.subr.bf16.mxu0 %v960_v0  ;;  %655 = vmatprep.mubr.msk.bf16.mxu0 %vm961_vm0, %v960_v0  ;;  %v269_v4 = vpack.c.bf16 %v268_v3, %v268_v3  ;;  %s1128_s1 = sshll.u32 %s1115_s10, 4  ;;  %vm331_vm2 = vcmask 60416   ;;  %s962_s22 = smov 80  }
  0x43   : > { %652 = vmatpush3.bf16.msra.mxu0 %v758_v1  ;;  %s963_s23 = smov 96   ;;  %s1131_s25 = scalar_lea.vmem [#allocation7], %s1128_s1 }
  0x44   : > { %653 = vmatprep.subr.bf16.mxu0 %v960_v0  ;;  %s964_s30 = smov 72   ;;  %s965_s5 = smov 88  }
  0x45   : > { %s966_s6 = smov 120   ;;  %s967_s7 = smov 64  }
  0x46   : > { %s968_s8 = smov 112   ;;  %s969_s12 = smov 56  }
  0x47   : > { %654 = vmatpush3.bf16.msra.mxu0 %v759_v2  ;;  %s970_s9 = smov 104   ;;  %s971_s27 = smov 48  }
  0x48   : > { %s972_s13 = smov 40   ;;  %s259_s14 = scalar_lea.vmem [#allocation8], %s1128_s1 }
  0x49   : > { %s431_s28 = sshll.u32 %s259_s14, 4  ;;  %s1143_s28 = int_to_ptr.vmem [resolvable:$true] %s431_s28 }
  0x4a   : > { %656 = vmatmul.mubr.msk.bf16.vlgmr.msra.gmra.mxu0 %vm286_vm1, %v269_v4 }
 0x10a   : > { %v324_v5 = vpop.f32.mrf.mxu0 }
 0x10b   : > { %v330_v6 = vpack.c.bf16 %v324_v5, %v324_v5 }
 0x10c   : > { %v657_v7 = vpop.f32.mrf.mxu0 }
 0x10d   : > { %364 = vrot.lane.b32.xlu1 %v330_v6, %s962_s22  ;;  %336 = vrot.lane.b32.xlu0 %v330_v6, %s963_s23  ;;  %332 = vst.msk [vmem:[%s1131_s25] sm:$0xf] %vm331_vm2, %v330_v6  ;;  %s394_s22 = sand.u32 1, %s1033_s21   ;;  %s1139_s23 = sshll.u32 %s946_s18, 8 }
 0x10e   : > { %v327_v8 = vpop.f32.mrf.mxu0  ;;  %s1153_s18 = scalar_lea.sflag [#allocation9], %s394_s22  ;;  %s814_s21 = scalar_lea.vmem %s1143_s28, 256 }
 0x10f   : > { %p815_p4 = scmp.ne.s32.totalorder %s1143_s28, %s814_s21 }
 0x110   : > { %v658_v9 = vpop.f32.mrf.mxu0 }
 0x111   : > { %379 = vrot.lane.b32.xlu1 %v330_v6, %s964_s30  ;;  %349 = vrot.lane.b32.xlu0 %v330_v6, %s965_s5  ;;  %p816_p8 = pnand %p815_p4, %p1087_p0 }
 0x113   : > { %p817_p12 = pneg %p816_p8 }
 0x115   : > { %344 = vrot.lane.b32.xlu1 %v330_v6, %s966_s6  ;;  %340 = vrot.lane.b32.xlu0 %v330_v6, %s967_s7  ;;  %s1149_s6 = scalar_lea.hbm %s1292_s3, %s1139_s23 }
 0x119   : > { %359 = vrot.lane.b32.xlu1 %v330_v6, %s968_s8  ;;  %354 = vrot.lane.b32.xlu0 %v330_v6, %s969_s12  ;;  %s973_s8 = smov [#allocation8]  }
 0x11a   : > { %s818_s12 = sshll.u32 %s973_s8, 4  ;;  %s819_s12 = int_to_ptr.vmem [resolvable:$false] %s818_s12 }
 0x11b   : > { %p821_p3 = scmp.lt.s32.totalorder %s1143_s28, %s819_s12 }
 0x11d   : > { %374 = vrot.lane.b32.xlu1 %v330_v6, %s970_s9  ;;  %369 = vrot.lane.b32.xlu0 %v330_v6, %s971_s27  ;;  %s820_s9 = scalar_lea.vmem %s819_s12, 512 }
 0x11e   : > { %p822_p5 = scmp.lt.s32.totalorder %s820_s9, %s814_s21 }
 0x120   : > { %p823_p7 = por %p822_p5, %p821_p3 }
 0x121   : > { %384 = vrot.lane.b32.xlu0 %v330_v6, %s972_s13 }
 0x122   : > { %p824_p2 = pnand %p823_p7, %p817_p12 }
 0x17f   : > { %v365_v10 = vpop.permute.xlu1 %364  ;;  %v337_v11 = vpop.permute.xlu0 %336 }
 0x180   : > { %628 = vst.msk [vmem:[%s259_s14 + $0x8] sm:$0xf] %vm331_vm2, %v365_v10  ;;  %339 = vst.msk [vmem:[%s259_s14] sm:$0xf] %vm331_vm2, %v337_v11 }
 0x183   : > { %v380_v12 = vpop.permute.xlu1 %379  ;;  %v350_v13 = vpop.permute.xlu0 %349 }
 0x184   : > { %631 = vst.msk [vmem:[%s259_s14 + $0xc] sm:$0xf] %vm331_vm2, %v380_v12  ;;  %625 = vst.msk [vmem:[%s259_s14 + $0x4] sm:$0xf] %vm331_vm2, %v350_v13 }
 0x185   : > { %827 = shalt.err (!%p824_p2)
}
 0x186   : > { %s828_s27 = scalar_lea.hbm %s1149_s6, 256  ;;  %s832_s22 = scalar_lea.hbm %s1292_s3, 512 }
 0x187   : > { %p829_p6 = scmp.ne.s32.totalorder %s1149_s6, %s828_s27  ;;  %p833_p11 = scmp.lt.s32.totalorder %s1149_s6, %s1292_s3 }
 0x188   : > { %p834_p1 = scmp.lt.s32.totalorder %s832_s22, %s828_s27 }
 0x189   : > { %p830_p9 = pnand %p829_p6, %p1087_p0 }
 0x18a   : > { %p835_p10 = por %p834_p1, %p833_p11 }
 0x18b   : > { %p831_p13 = pneg %p830_p9 }
 0x18d   : > { %p836_p4 = pnand %p835_p10, %p831_p13 }
 0x18f   : > { %839 = shalt.err (!%p836_p4)
}
 0x190   : > { %s974_s21 = smov 4   ;;  %v345_v14 = vpop.permute.xlu1 %344  ;;  %v341_v15 = vpop.permute.xlu0 %340  ;;  %s1182_s8 = scalar_lea.vmem [#allocation10], %s1128_s1 }
 0x191   : > { %666 = dma.vmem_to_hbm [thread:$0]  (%p1087_p0), %s1143_s28, 256, %s1149_s6, %s1153_s18, %s967_s7, %s967_s7, %s974_s21  }
 0x192   : > { %624 = vst.msk [vmem:[%s1131_s25 + $0x4] sm:$0xf] %vm331_vm2, %v345_v14  ;;  %343 = vst.msk [vmem:[%s1182_s8] sm:$0xf] %vm331_vm2, %v341_v15  ;;  %s414_s12 = sshll.u32 %s1131_s25, 4  ;;  %s1197_s1 = scalar_lea.hbm %s1291_s2, %s1139_s23  ;;  %s1191_s12 = int_to_ptr.vmem [resolvable:$true] %s414_s12 }
 0x193   : > { %s448_s9 = sshll.u32 %s1182_s8, 4  ;;  %s390_s27 = scalar_lea.sflag [#allocation4], %s1115_s10  ;;  %s1230_s9 = int_to_ptr.vmem [resolvable:$true] %s448_s9 }
 0x194   : > { %v360_v16 = vpop.permute.xlu1 %359  ;;  %v355_v17 = vpop.permute.xlu0 %354  ;;  %s840_s13 = scalar_lea.vmem %s1191_s12, 256  ;;  %s975_s14 = smov [#allocation7]  }
 0x195   : > { %627 = vst.msk [vmem:[%s1131_s25 + $0x8] sm:$0xf] %vm331_vm2, %v360_v16  ;;  %626 = vst.msk [vmem:[%s1182_s8 + $0x4] sm:$0xf] %vm331_vm2, %v355_v17  ;;  %p841_p8 = scmp.ne.s32.totalorder %s1191_s12, %s840_s13  ;;  %s844_s22 = sshll.u32 %s975_s14, 4  ;;  %s845_s22 = int_to_ptr.vmem [resolvable:$false] %s844_s22 }
 0x196   : > { %s846_s30 = scalar_lea.vmem %s845_s22, 512  ;;  %p847_p5 = scmp.lt.s32.totalorder %s1191_s12, %s845_s22 }
 0x197   : > { %p842_p12 = pnand %p841_p8, %p1087_p0  ;;  %p848_p7 = scmp.lt.s32.totalorder %s846_s30, %s840_s13 }
 0x198   : > { %v375_v18 = vpop.permute.xlu1 %374  ;;  %v370_v19 = vpop.permute.xlu0 %369 }
 0x199   : > { %630 = vst.msk [vmem:[%s1131_s25 + $0xc] sm:$0xf] %vm331_vm2, %v375_v18  ;;  %629 = vst.msk [vmem:[%s1182_s8 + $0x8] sm:$0xf] %vm331_vm2, %v370_v19  ;;  %p843_p3 = pneg %p842_p12  ;;  %p849_p2 = por %p848_p7, %p847_p5 }
 0x19b   : > { %p850_p6 = pnand %p849_p2, %p843_p3 }
 0x19d   : > { %853 = shalt.err (!%p850_p6)
}
 0x19e   : > { %s854_s25 = scalar_lea.hbm %s1197_s1, 256  ;;  %s858_s28 = scalar_lea.hbm %s1291_s2, 512 }
 0x19f   : > { %p855_p9 = scmp.ne.s32.totalorder %s1197_s1, %s854_s25  ;;  %p859_p1 = scmp.lt.s32.totalorder %s1197_s1, %s1291_s2 }
 0x1a0   : > { %p860_p10 = scmp.lt.s32.totalorder %s858_s28, %s854_s25 }
 0x1a1   : > { %p856_p13 = pnand %p855_p9, %p1087_p0 }
 0x1a2   : > { %p861_p4 = por %p860_p10, %p859_p1 }
 0x1a3   : > { %p857_p11 = pneg %p856_p13 }
 0x1a5   : > { %p862_p8 = pnand %p861_p4, %p857_p11 }
 0x1a7   : > { %865 = shalt.err (!%p862_p8)
}
 0x1a8   : > { %665 = dma.vmem_to_hbm [thread:$0]  (%p1087_p0), %s1191_s12, 256, %s1197_s1, %s390_s27, %s967_s7, %s967_s7, %s974_s21   ;;  %v385_v20 = vpop.permute.xlu0 %384 }
 0x1a9   : > { %s1236_s30 = scalar_lea.hbm %s1293_s4, %s1139_s23  ;;  %632 = vst.msk [vmem:[%s1182_s8 + $0xc] sm:$0xf] %vm331_vm2, %v385_v20  ;;  %s866_s25 = scalar_lea.vmem %s1230_s9, 256 }
 0x1aa   : > { %p867_p12 = scmp.ne.s32.totalorder %s1230_s9, %s866_s25  ;;  %s976_s12 = smov [#allocation10]  }
 0x1ab   : > { %s870_s1 = sshll.u32 %s976_s12, 4  ;;  %s871_s1 = int_to_ptr.vmem [resolvable:$false] %s870_s1 }
 0x1ac   : > { %p868_p3 = pnand %p867_p12, %p1087_p0  ;;  %s872_s27 = scalar_lea.vmem %s871_s1, 512 }
 0x1ad   : > { %p873_p7 = scmp.lt.s32.totalorder %s1230_s9, %s871_s1  ;;  %p874_p2 = scmp.lt.s32.totalorder %s872_s27, %s866_s25 }
 0x1ae   : > { %p869_p5 = pneg %p868_p3 }
 0x1af   : > { %p875_p6 = por %p874_p2, %p873_p7 }
 0x1b1   : > { %p876_p9 = pnand %p875_p6, %p869_p5 }
 0x1b3   : > { %879 = shalt.err (!%p876_p9)
}
 0x1b4   : > { %s880_s23 = scalar_lea.hbm %s1236_s30, 256  ;;  %s884_s5 = scalar_lea.hbm %s1293_s4, 512 }
 0x1b5   : > { %p881_p13 = scmp.ne.s32.totalorder %s1236_s30, %s880_s23  ;;  %p885_p10 = scmp.lt.s32.totalorder %s1236_s30, %s1293_s4 }
 0x1b6   : > { %p886_p4 = scmp.lt.s32.totalorder %s884_s5, %s880_s23 }
 0x1b7   : > { %p882_p11 = pnand %p881_p13, %p1087_p0 }
 0x1b8   : > { %p887_p8 = por %p886_p4, %p885_p10 }
 0x1b9   : > { %p883_p1 = pneg %p882_p11 }
 0x1bb   : > { %p888_p12 = pnand %p887_p8, %p883_p1 }
 0x1bd   : > { %891 = shalt.err (!%p888_p12)
}
 0x1be   : > { %667 = dma.vmem_to_hbm [thread:$0]  (%p1087_p0), %s1230_s9, 256, %s1236_s30, %s1153_s18, %s967_s7, %s967_s7, %s974_s21  }
 0x1bf PF: > { %s463_s14 = sand.u32 1, %s934_s15   ;;  %p1308_p3 = scmp.ne.s32.totalorder %s1298_s24, 0 }
 0x1c0   : > { %p1309_p5 = scmp.ge.s32.totalorder %s954_s20, 2  ;;  %s464_s13 = scalar_lea.sflag [#allocation4], %s463_s14 }
 0x1c2   : > { %p680_p7 = pnand %p1309_p5, %p1308_p3 }
 0x1c4   : > { %p681_p2 = pneg %p680_p7 }
 0x1c6   : > { %925 = dma.done.wait (%p681_p2), %s464_s13, 256  }
 0x1c7   : > { %927 = vsyncadd (%p681_p2), %s464_s13, 4294967040  ;;  %s1310_s11 = sadd.s32 4294967294, %s954_s20  }
 0x1c8   : > { %s472_s22 = sand.u32 1, %s1310_s11  }
 0x1c9   : > { %s473_s25 = scalar_lea.sflag [#allocation9], %s472_s22 }
 0x1ca   : > { %929 = dma.done.wait (%p681_p2), %s473_s25, 512  }
 0x1cb   : > { %931 = vsyncadd (%p681_p2), %s473_s25, 4294966784  ;;  %s25_s20 = sadd.s32 1, %s954_s20   ;;  %s1311_s15 = smov %s938_s16 }
 0x1cc   : > { %p22_p0 = scmp.ge.s32.totalorder %s25_s20, 4   ;;  %s1312_s16 = smov %s942_s17 }
 0x1cd   : > { %s1313_s17 = smov %s1096_s26  ;;  %s1314_s18 = smov %s950_s19 }
 0x1ce   : > { %s1315_s19 = smov %s1317_s29  ;;  %24 = sbr.rel (!%p22_p0) target bundleno = 11 (0xb), region = 118 }
 0x1d3   :  { %487 = vsyncpa [#allocation3], 1 }
 0x1d4   :  { %489 = vsyncpa [#allocation3 + $0x1], 1 }
 0x1d5   :  { %490 = vsyncpa [#allocation6], 1 }
 0x1d6   :  { %491 = vsyncpa [#allocation4], 1 }
 0x1d7   :  { %493 = vsyncpa [#allocation4 + $0x1], 1 }
 0x1d8   :  { %494 = vsyncpa [#allocation9], 1 }
 0x1d9   :  { %496 = vsyncpa [#allocation9 + $0x1], 1 }

</bundles_post_ra>
